<compile_context>
chip_gen: v7x
topology: tpu7x:2x2x1
jax: 0.10.0
libtpu: 0.0.40
codegen_flags: <defaults>
</compile_context>

<pallas_src>
import jax
import jax.numpy as jnp
from jax import lax
from jax.experimental import pallas as pl
from jax.experimental.pallas import tpu as pltpu


def _round_up(x, m):
    return (x + m - 1) // m * m


def _unary_kernel(x_ref, w1_ref, b1_ref, w2_ref, o_ref):
    # x_ref : (tm, E)     tile of tokens (rows on sublanes, features on lanes)
    # w1_ref: (E, E)      embed weight, pre-transposed to (E_in, E_out), resident
    # b1_ref: (1, E)      embed bias, resident
    # w2_ref: (1, E)      feature_reduce weight as a lane row, resident
    # o_ref : (1, 1, tm)  lane-dense output tile (one potential per token)
    x = x_ref[...]
    h = jnp.dot(x, w1_ref[...], preferred_element_type=jnp.float32)
    h = jnp.maximum(h + b1_ref[...].astype(jnp.float32), 0.0)   # ReLU (dropout == identity)
    # Contract the feature axis of (1, E) and (tm, E) -> (1, tm): the result is
    # already lane-dense, so it stores straight into the output tile with
    # unmasked vector stores (no (tm, 1) width-1 MXU result).
    o = lax.dot_general(
        w2_ref[...].astype(jnp.float32), h,
        dimension_numbers=(((1,), (1,)), ((), ())),
        preferred_element_type=jnp.float32,
    )
    o_ref[...] = o[None].astype(o_ref.dtype)


def _vmem_capacity_bytes():
    try:
        return int(pltpu.get_tpu_info().vmem_capacity_bytes)
    except Exception:
        return 64 << 20  # conservative (v7x per-core VMEM)


def _choose_tm(M, E, x_itemsize, vmem_cap):
    """Row-tile size: ~4 MiB of streamed x per step, multiple of 128 rows,
    clamped by VMEM budget and by M; prefers >= 2 grid steps when possible."""
    target_bytes = 4 << 20
    rows = max(128, target_bytes // max(1, E * x_itemsize))
    tm = _round_up(rows, 128)

    # Keep 2 x-tile buffers + 2 out buffers inside ~half the physical VMEM
    # (leaves room for the resident weights and compiler scratch).
    budget_rows = (vmem_cap // 2) // max(1, 2 * E * x_itemsize + 2 * 4)
    if budget_rows >= 128:
        tm = min(tm, (budget_rows // 128) * 128)
    else:
        tm = 128

    # Never larger than the (128-aligned) token count.
    tm = min(tm, _round_up(M, 128))

    # Prefer at least 2 grid steps: feeds both v7x TensorCores and gives the
    # pipeline a next tile to prefetch.
    if M > 128 and pl.cdiv(M, tm) < 2:
        tm = max(128, _round_up(pl.cdiv(M, 2), 128))

    # Tiny-M case: shrink to an 8-aligned (sublane) row tile.
    if _round_up(M, 8) < tm:
        tm = _round_up(M, 8)
    return tm


def _resident_spec(shape):
    """BlockSpec for a grid-invariant operand; single-buffered when supported."""
    index_map = lambda i, _n=len(shape): (0,) * _n
    try:
        return pl.BlockSpec(shape, index_map, pipeline_mode=pl.Buffered(1))
    except Exception:
        return pl.BlockSpec(shape, index_map)


def unary_forward(x, w_embed, b_embed, w_reduce, b_reduce):
    """x: (B, N, E).  Returns (B, N) float32 (== Unary.forward, eval mode)."""
    B, N, E = x.shape
    M = B * N

    x_itemsize = jnp.dtype(x.dtype).itemsize
    w_itemsize = jnp.dtype(w_embed.dtype).itemsize
    vmem_cap = _vmem_capacity_bytes()

    tm = _choose_tm(M, E, x_itemsize, vmem_cap)
    grid_m = pl.cdiv(M, tm)

    # No padding of x: the ragged last block reads unspecified rows; each
    # output element depends only on its own row and the [:M] slice below
    # drops the padded positions.
    x_flat = x.reshape(M, E)

    # Conv1d(E, E, 1) weight (E_out, E_in) -> pre-transpose so kernel does x @ W1^T.
    w1_t = jnp.transpose(w_embed, (1, 0))        # (E_in, E_out)
    b1 = b_embed.reshape(1, E)
    w2 = w_reduce.reshape(1, E)                  # feature_reduce weight as a lane row

    # Double-buffered x/out tiles + single-buffered resident weights, with
    # headroom, capped at 75% of this generation's physical VMEM.
    vmem_need = (2 * tm * E * x_itemsize + 2 * tm * 4
                 + E * E * w_itemsize + 4 * E * w_itemsize)
    vmem_limit = int(min(max(2 * vmem_need, 16 << 20), int(0.75 * vmem_cap)))

    out = pl.pallas_call(
        _unary_kernel,
        out_shape=jax.ShapeDtypeStruct((grid_m, 1, tm), jnp.float32),
        grid_spec=pltpu.PrefetchScalarGridSpec(
            num_scalar_prefetch=0,
            grid=(grid_m,),
            in_specs=[
                pl.BlockSpec((tm, E), lambda i: (i, 0)),   # x tile (streamed)
                _resident_spec((E, E)),                    # W1^T (resident, 1 buffer)
                _resident_spec((1, E)),                    # b1
                _resident_spec((1, E)),                    # w2 row
            ],
            out_specs=pl.BlockSpec((1, 1, tm), lambda i: (i, 0, 0)),
        ),
        compiler_params=pltpu.CompilerParams(
            dimension_semantics=("parallel",),
            vmem_limit_bytes=vmem_limit,
        ),
    )(x_flat, w1_t, b1, w2)

    # b2 is a single scalar: add it outside the kernel (drops a padded (1,1)
    # VMEM block + per-step DMA).
    return out.reshape(grid_m * tm)[:M].reshape(B, N) + b_reduce[0]


def _reference(x, w_embed, b_embed, w_reduce, b_reduce):
    # Pure-JAX reference matching the PyTorch math (eval-mode dropout).
    h = jnp.einsum("bne,oe->bno", x, w_embed) + b_embed[None, None, :]
    h = jnp.maximum(h, 0.0)
    return jnp.einsum("bne,e->bn", h, w_reduce.reshape(-1)) + b_reduce[0]


def _run_case(B, N, E, seed):
    key = jax.random.PRNGKey(seed)
    kx, k1, k2, k3, k4 = jax.random.split(key, 5)
    x = jax.random.normal(kx, (B, N, E), dtype=jnp.float32)
    bound = 1.0 / (E ** 0.5)
    w_embed = jax.random.uniform(k1, (E, E), jnp.float32, -bound, bound)   # Conv1d(E,E,1) weight squeezed
    b_embed = jax.random.uniform(k2, (E,), jnp.float32, -bound, bound)
    w_reduce = jax.random.uniform(k3, (1, E), jnp.float32, -bound, bound)  # Conv1d(E,1,1) weight squeezed
    b_reduce = jax.random.uniform(k4, (1,), jnp.float32, -bound, bound)

    out = jax.block_until_ready(unary_forward(x, w_embed, b_embed, w_reduce, b_reduce))
    ref = _reference(x, w_embed, b_embed, w_reduce, b_reduce)
    assert out.shape == (B, N)
    assert jnp.allclose(out, ref, atol=1e-4, rtol=1e-4), f"mismatch vs reference ({B},{N},{E})"


if __name__ == "__main__":
    # Primary small case from the module spec.
    _run_case(B=2, N=8, E=32, seed=0)
    # Ragged / multi-step case (M = 150 not a multiple of the 128-row tile).
    _run_case(B=3, N=50, E=32, seed=1)
    print("KERNEL_OK")
</pallas_src>

<mosaic_0001>
module attributes {stable_mosaic.version = 11 : i64} {
  func.func @_unary_kernel(%arg0: i32, %arg1: memref<16x32xf32, #tpu.memory_space<vmem>>, %arg2: memref<32x32xf32, #tpu.memory_space<vmem>>, %arg3: memref<1x32xf32, #tpu.memory_space<vmem>>, %arg4: memref<1x32xf32, #tpu.memory_space<vmem>>, %arg5: memref<1x1x16xf32, #tpu.memory_space<vmem>>) attributes {dimension_semantics = [#tpu.dimension_semantics<parallel>], iteration_bounds = array<i64: 1>, scalar_prefetch = 0 : i64, scratch_operands = 0 : i64, tpu.core_type = #tpu.core_type<tc>, window_params = [{transform_indices = @transform_0, window_bounds = array<i64: 16, 32>}, {pipeline_mode = #tpu.pipeline_mode<synchronous>, transform_indices = @transform_1, window_bounds = array<i64: 32, 32>}, {pipeline_mode = #tpu.pipeline_mode<synchronous>, transform_indices = @transform_2, window_bounds = array<i64: 1, 32>}, {pipeline_mode = #tpu.pipeline_mode<synchronous>, transform_indices = @transform_3, window_bounds = array<i64: 1, 32>}, {transform_indices = @transform_4, window_bounds = array<i64: 1, 1, 16>}]} {
    %c0 = arith.constant 0 : index
    %c0_0 = arith.constant 0 : index
    %0 = vector.load %arg1[%c0, %c0_0] : memref<16x32xf32, #tpu.memory_space<vmem>>, vector<16x32xf32>
    %c0_1 = arith.constant 0 : index
    %c0_2 = arith.constant 0 : index
    %1 = vector.load %arg2[%c0_1, %c0_2] : memref<32x32xf32, #tpu.memory_space<vmem>>, vector<32x32xf32>
    %cst = arith.constant dense<0.000000e+00> : vector<16x32xf32>
    %2 = tpu.matmul %0, %1, %cst {dimension_numbers = #tpu.dot_dimension_numbers<[1], [0], [0], [1], [0, 0, 1, 1], [], []>} : vector<16x32xf32>, vector<32x32xf32>, vector<16x32xf32> -> vector<16x32xf32>
    %c0_3 = arith.constant 0 : index
    %c0_4 = arith.constant 0 : index
    %3 = vector.load %arg3[%c0_3, %c0_4] : memref<1x32xf32, #tpu.memory_space<vmem>>, vector<1x32xf32>
    %4 = vector.broadcast %3 : vector<1x32xf32> to vector<16x32xf32>
    %5 = arith.addf %2, %4 : vector<16x32xf32>
    %cst_5 = arith.constant 0.000000e+00 : f32
    %6 = vector.broadcast %cst_5 : f32 to vector<16x32xf32>
    %7 = arith.maximumf %5, %6 : vector<16x32xf32>
    %c0_6 = arith.constant 0 : index
    %c0_7 = arith.constant 0 : index
    %8 = vector.load %arg4[%c0_6, %c0_7] : memref<1x32xf32, #tpu.memory_space<vmem>>, vector<1x32xf32>
    %cst_8 = arith.constant dense<0.000000e+00> : vector<1x16xf32>
    %9 = tpu.matmul %8, %7, %cst_8 {dimension_numbers = #tpu.dot_dimension_numbers<[1], [1], [0], [0], [0, 0, 1, 0], [], []>} : vector<1x32xf32>, vector<16x32xf32>, vector<1x16xf32> -> vector<1x16xf32>
    %10 = vector.shape_cast %9 : vector<1x16xf32> to vector<1x1x16xf32>
    %c0_9 = arith.constant 0 : index
    %c0_10 = arith.constant 0 : index
    %c0_11 = arith.constant 0 : index
    %11 = vector.load %arg5[%c0_9, %c0_10, %c0_11] : memref<1x1x16xf32, #tpu.memory_space<vmem>>, vector<1x1x16xf32>
    tpu.vector_store %arg5[%c0_9, %c0_10, %c0_11], %10 {strides = array<i32>} : memref<1x1x16xf32, #tpu.memory_space<vmem>>, vector<1x1x16xf32>,
    return
  }
  func.func @transform_0(%arg0: i32) -> (i32, i32) {
    %c0_i32 = arith.constant 0 : i32
    %c0_i32_0 = arith.constant 0 : i32
    return %arg0, %c0_i32 : i32, i32
  }
  func.func @transform_1(%arg0: i32) -> (i32, i32) {
    %c0_i32 = arith.constant 0 : i32
    %c0_i32_0 = arith.constant 0 : i32
    %c0_i32_1 = arith.constant 0 : i32
    return %c0_i32, %c0_i32_0 : i32, i32
  }
  func.func @transform_2(%arg0: i32) -> (i32, i32) {
    %c0_i32 = arith.constant 0 : i32
    %c0_i32_0 = arith.constant 0 : i32
    %c0_i32_1 = arith.constant 0 : i32
    return %c0_i32, %c0_i32_0 : i32, i32
  }
  func.func @transform_3(%arg0: i32) -> (i32, i32) {
    %c0_i32 = arith.constant 0 : i32
    %c0_i32_0 = arith.constant 0 : i32
    %c0_i32_1 = arith.constant 0 : i32
    return %c0_i32, %c0_i32_0 : i32, i32
  }
  func.func @transform_4(%arg0: i32) -> (i32, i32, i32) {
    %c0_i32 = arith.constant 0 : i32
    %c0_i32_0 = arith.constant 0 : i32
    %c0_i32_1 = arith.constant 0 : i32
    return %arg0, %c0_i32, %c0_i32_0 : i32, i32, i32
  }
}

</mosaic_0001>

<bundles_post_ra>
// kernel: tpu_custom_call.1
= control target key start
LH: loop header
LB: loop body
LE: loop exit
PB: predicated region body
PF: predicated region fallthrough
CT: control target
= control target key end

     0   :  { %9 = vsyncpa [#allocation3], 0  ;;  %s446_s0 = inlined_call_operand.hbm [shape: f32[16,32], index: 0, kind: input, shape index: {}]   ;;  %s447_s1 = inlined_call_operand.hbm [shape: f32[32,32], index: 1, kind: input, shape index: {}]   ;;  %s448_s2 = inlined_call_operand.vmem [shape: f32[1,32], index: 2, kind: input, shape index: {}]   ;;  %s449_s3 = inlined_call_operand.vmem [shape: f32[1,32], index: 3, kind: input, shape index: {}]   ;;  %s450_s4 = inlined_call_operand.hbm [shape: f32[1,1,16], index: 4, kind: output, shape index: {}]  }
   0x1   :  { %10 = vsyncpa [#allocation6], 0 }
   0x2   :  { %11 = vsyncpa [#allocation4], 0  ;;  %s366_s15 = smov [#allocation2]   ;;  %s294_s19 = scalar_lea.hbm %s446_s0, 256 }
   0x3   :  { %s17_s16 = sshll.u32 %s366_s15, 4  ;;  %p295_p0 = scmp.ne.s32.totalorder %s446_s0, %s294_s19  ;;  %s18_s16 = int_to_ptr.vmem [resolvable:$true] %s17_s16 }
   0x4   :  { %p298_p1 = scmp.lt.u32.totalorder %s294_s19, %s446_s0 }
   0x6   :  { %p300_p2 = pnand %p298_p1, %p295_p0 }
   0x8   :  { %303 = shalt.err (!%p300_p2)
}
   0x9   :  { %s304_s24 = scalar_lea.vmem %s18_s16, 256  ;;  %p309_p4 = scmp.lt.s32.totalorder %s18_s16, %s18_s16 }
   0xa   :  { %p305_p3 = scmp.ne.s32.totalorder %s18_s16, %s304_s24  ;;  %p310_p5 = scmp.lt.s32.totalorder %s304_s24, %s304_s24 }
   0xc   :  { %p311_p6 = por %p310_p5, %p309_p4 }
   0xe   :  { %p312_p7 = pnand %p311_p6, %p305_p3 }
  0x10   :  { %315 = shalt.err (!%p312_p7)
}
  0x11   :  { %s367_s25 = smov 128   ;;  %s368_s26 = smov 8  }
  0x12   :  { %23 = dma.hbm_to_vmem [thread:$0]  %s446_s0, 256, %s18_s16, [#allocation3], %s367_s25, %s367_s25, %s368_s26  }
  0x13   :  { %s369_s29 = smov [#allocation5]   ;;  %s316_s7 = scalar_lea.hbm %s447_s1, 512 }
  0x14   :  { %s29_s30 = sshll.u32 %s369_s29, 4  ;;  %p317_p8 = scmp.ne.s32.totalorder %s447_s1, %s316_s7  ;;  %s30_s30 = int_to_ptr.vmem [resolvable:$true] %s29_s30 }
  0x15   :  { %p320_p9 = scmp.lt.u32.totalorder %s316_s7, %s447_s1 }
  0x17   :  { %p322_p10 = pnand %p320_p9, %p317_p8 }
  0x19   :  { %325 = shalt.err (!%p322_p10)
}
  0x1a   :  { %s326_s12 = scalar_lea.vmem %s30_s30, 512  ;;  %p331_p12 = scmp.lt.s32.totalorder %s30_s30, %s30_s30 }
  0x1b   :  { %p327_p11 = scmp.ne.s32.totalorder %s30_s30, %s326_s12  ;;  %p332_p13 = scmp.lt.s32.totalorder %s326_s12, %s326_s12 }
  0x1d   :  { %p333_p0 = por %p332_p13, %p331_p12 }
  0x1f   :  { %p334_p1 = pnand %p333_p0, %p327_p11 }
  0x21   :  { %337 = shalt.err (!%p334_p1)
}
  0x22   :  { %35 = dma.hbm_to_vmem [thread:$0]  %s447_s1, 512, %s30_s30, [#allocation6], %s367_s25, %s367_s25, %s368_s26  }
  0x23   :  { %360 = dma.done.wait [#allocation3], 256  }
  0x24   :  { %361 = vsyncadd [#allocation3], 4294967040 }
  0x25   :  { %362 = dma.done.wait [#allocation6], 512  }
  0x26   :  { %363 = vsyncadd [#allocation6], 4294966784  ;;  %vm59_vm0 = vcmask 261120   ;;  %v48_v0 = vld [vmem:[#allocation5] sm:$0xff]  ;;  %v49_v1 = vld [vmem:[#allocation5 + $0x8] sm:$0xff]  ;;  %v370_v8 = vmov 0.0|0.0  }
  0x27   :  { %v50_v2 = vld [vmem:[#allocation5 + $0x10] sm:$0xff]  ;;  %v274_v3 = vpack.c.bf16 %v49_v1, %v48_v0  ;;  %v51_v4 = vld [vmem:[#allocation5 + $0x18] sm:$0xff]  ;;  %282 = vmatprep.subr.bf16.mxu1 %v370_v8  ;;  %vm371_vm1 = vmmov 0   ;;  %v372_v9 = vmov 0.0   ;;  %vm284_vm2 = vmpackc.low %vm59_vm0, %vm59_vm0  ;;  %s373_s17 = smov [#allocation7]   ;;  %vm223_vm3 = vcmask 122880  }
  0x28   :  { %v46_v5 = vld [vmem:[#allocation2] sm:$0xff]  ;;  %v278_v6 = vpack.c.bf16 %v51_v4, %v50_v2  ;;  %v47_v7 = vld [vmem:[#allocation2 + $0x8] sm:$0xff]  ;;  %271 = vmatprep.mubr.msk.f32.mxu1 %vm371_vm1, %v372_v9  ;;  %s231_s18 = sshll.u32 %s373_s17, 4  ;;  %s232_s18 = int_to_ptr.vmem [resolvable:$true] %s231_s18 }
  0x29   :  { %264 = vmatprep.mubr.msk.f32.mxu0 %vm59_vm0, %v46_v5  ;;  %275 = vmatprep.subr.bf16.mxu0 %v274_v3  ;;  %v241_v10 = vld [vmem:[%s448_s2] ss:$0 sm:$0xff]  ;;  %s338_s2 = scalar_lea.vmem %s232_s18, 16  ;;  %s342_s19 = scalar_lea.vmem %s232_s18, 32 }
  0x2a   :  { %277 = vmatpush3.bf16.msra.mxu0 %v274_v3  ;;  %v143_v18 = vld [vmem:[%s449_s3] sm:$0x1]  ;;  %p339_p2 = scmp.ne.s32.totalorder %s232_s18, %s338_s2  ;;  %p343_p3 = scmp.lt.s32.totalorder %s232_s18, %s232_s18 }
  0x2b   :  { %279 = vmatprep.subr.bf16.mxu0 %v278_v6  ;;  %p344_p4 = scmp.lt.s32.totalorder %s342_s19, %s338_s2 }
  0x2d   :  { %p345_p5 = por %p344_p4, %p343_p3 }
  0x2e   :  { %281 = vmatpush3.bf16.msra.mxu0 %v278_v6 }
  0x2f   :  { %p346_p6 = pnand %p345_p5, %p339_p2 }
  0x31   :  { %265 = vmatmul.mubr.msk.f32.vlgmr.msra.gmra.mrb[0].mxu0 %vm59_vm0, %v47_v7 }
 0x104   :  { %v266_v11 = vpop.f32.mrb[0].mxu0 }
 0x105   :  { %v138_v12 = vadd.f32 %v266_v11, %v241_v10  ;;  %v132_v13 = vpop.f32.mrb[1].mxu0 }
 0x106   :  { %v133_v14 = vadd.f32 %v241_v10, %v132_v13 }
 0x107   :  { %v142_v15 = vmax.f32 %v138_v12, 0.0 }
 0x108   :  { %v141_v16 = vmax.f32 %v133_v14, 0.0 }
 0x10a   :  { %v283_v17 = vpack.c.bf16 %v142_v15, %v141_v16 }
 0x10c   :  { %285 = vmatpush3.bf16.xpose.msk.msra.mxu1 %vm284_vm2, %v283_v17 }
 0x113   :  { %272 = vmatmul.mubr.msk.f32.vlgmr.msra.gmra.mrb[0].mxu1 %vm59_vm0, %v143_v18 }
 0x1e6   :  { %v219_v19 = vpop.f32.mrb[0].mxu1 }
 0x1e7   :  { %v273_v20 = vpop.f32.mrb[1].mxu1  ;;  %224 = vst.msk [vmem:[#allocation7] sm:$0x1] %vm223_vm3, %v219_v19 }
 0x1e8   :  { %349 = shalt.err (!%p346_p6)
}
 0x1e9   :  { %s350_s3 = scalar_lea.hbm %s450_s4, 16 }
 0x1ea   :  { %p351_p7 = scmp.ne.s32.totalorder %s450_s4, %s350_s3  ;;  %p354_p8 = scmp.lt.u32.totalorder %s350_s3, %s450_s4 }
 0x1ec   :  { %p356_p9 = pnand %p354_p8, %p351_p7 }
 0x1ee   :  { %359 = shalt.err (!%p356_p9)
}
 0x1ef   :  { %234 = dma.vmem_to_hbm [thread:$0]  %s232_s18, 16, %s450_s4, [#allocation4]  }
 0x1f0   :  { %364 = dma.done.wait [#allocation4], 16  }
 0x1f1   :  { %365 = vsyncadd [#allocation4], 4294967280 }
 0x1f2   :  { %238 = vsyncpa [#allocation3], 1 }
 0x1f3   :  { %239 = vsyncpa [#allocation6], 1 }
 0x1f4   :  { %240 = vsyncpa [#allocation4], 1 }

</bundles_post_ra>
